<compile_context>
chip_gen: v7x
topology: tpu7x:2x2x1
jax: 0.10.0
libtpu: 0.0.40
codegen_flags: <defaults>
</compile_context>

<pallas_src>
import functools

import jax
import jax.numpy as jnp
from jax.experimental import pallas as pl
from jax.experimental.pallas import tpu as pltpu

LANE = 128    # lane width of a vreg
ALIGN = 16    # bf16 sublane tile -> keep every slab segment start/extent aligned


def _round_up(n, m):
    return ((n + m - 1) // m) * m


def _choose_tm(batch, tm_max=4096):
    """Pick the batch tile: largest multiple of 8 that divides B (no wrapper
    jnp.pad pass), <= tm_max, preferring an even tile count so v7x's two
    TensorCores both get work.  Returns (tm, pad_rows)."""
    cap = min(tm_max, batch)
    best_even = best_multi = best_any = None
    for tm in range(8, cap + 1, 8):
        if batch % tm:
            continue
        n = batch // tm
        best_any = tm
        if n >= 2:
            best_multi = tm
        if n % 2 == 0:
            best_even = tm
    for choice in (best_even, best_multi, best_any):
        if choice is not None:
            return choice, 0
    # Ragged fallback (extra HBM pass) -- only when B has no usable divisor.
    tm = min(tm_max, _round_up(batch, 8))
    return tm, _round_up(batch, tm) - batch


def _mlp_kernel(x_ref, w_ref, b_ref, o_ref, *,
                n_in, k_pad, off_w1, off_w2, off_w3, n_out):
    # x tile: [TM, n_in] (f32 or bf16) -> bf16 for the MXU.
    x = x_ref[...].astype(jnp.bfloat16)
    if k_pad > n_in:
        # Zero-extend the contraction dim so the w1 slice is tile-aligned.
        x = jnp.concatenate(
            [x, jnp.zeros((x.shape[0], k_pad - n_in), jnp.bfloat16)], axis=1)

    # layer1 + ReLU  (hidden padded to 128 lanes; pad lanes stay exactly 0)
    w1 = w_ref[off_w1:off_w1 + k_pad, :]                 # [k_pad, 128] bf16
    b1 = b_ref[0:1, :]                                   # [1, 128] f32
    h1 = jnp.maximum(jnp.dot(x, w1, preferred_element_type=jnp.float32) + b1, 0.0)
    # dropout(p=0.3) = identity at inference

    # layer2 + ReLU
    w2 = w_ref[off_w2:off_w2 + LANE, :]                  # [128, 128] bf16
    b2 = b_ref[1:2, :]
    h2 = jnp.maximum(
        jnp.dot(h1.astype(jnp.bfloat16), w2, preferred_element_type=jnp.float32) + b2,
        0.0)
    # dropout(p=0.3) = identity at inference

    # layer3 (logits): store only the real num_speakers lanes; because the
    # output block spans the full logits width, the HBM writeback is contiguous.
    w3 = w_ref[off_w3:off_w3 + LANE, :]                  # [128, 128] bf16
    b3 = b_ref[2:3, :]
    out = jnp.dot(h2.astype(jnp.bfloat16), w3, preferred_element_type=jnp.float32) + b3
    o_ref[...] = out[:, :n_out].astype(o_ref.dtype)


def pack_params(params, input_size, hidden_size, num_speakers):
    """Pack weights into one bf16 [rows, 128] slab (w stored as [in, out]) and
    biases into a small f32 [8, 128] slab.  Padded rows/lanes are zero, so the
    padded hidden/output columns stay exactly zero through ReLU and matmuls."""
    half = hidden_size // 2
    assert hidden_size % 2 == 0
    assert hidden_size <= LANE and half <= LANE and num_speakers <= LANE

    k_pad = _round_up(input_size, ALIGN)
    off_w1, off_w2, off_w3 = 0, k_pad, k_pad + LANE
    rows = k_pad + 2 * LANE

    wslab = jnp.zeros((rows, LANE), jnp.float32)
    wslab = wslab.at[off_w1:off_w1 + input_size, :hidden_size].set(params["w1"])
    wslab = wslab.at[off_w2:off_w2 + hidden_size, :half].set(params["w2"])
    wslab = wslab.at[off_w3:off_w3 + half, :num_speakers].set(params["w3"])
    wslab = wslab.astype(jnp.bfloat16)

    bslab = jnp.zeros((8, LANE), jnp.float32)            # biases stay f32
    bslab = bslab.at[0, :hidden_size].set(params["b1"][0])
    bslab = bslab.at[1, :half].set(params["b2"][0])
    bslab = bslab.at[2, :num_speakers].set(params["b3"][0])

    offs = {"w1": off_w1, "w2": off_w2, "w3": off_w3, "k_pad": k_pad}
    return wslab, bslab, offs


def speaker_recognition_forward(x, wslab, bslab, offs, *,
                                input_size, num_speakers, tm_max=4096):
    """x: [B, input_size] (f32 or bf16). Returns [B, num_speakers] f32 logits."""
    B = x.shape[0]
    tm, pad = _choose_tm(B, tm_max)
    if pad:
        x = jnp.pad(x, ((0, pad), (0, 0)))   # fallback only; avoided when B % tm == 0
    b_pad = B + pad
    n_tiles = b_pad // tm

    kernel = functools.partial(
        _mlp_kernel, n_in=input_size, k_pad=offs["k_pad"],
        off_w1=offs["w1"], off_w2=offs["w2"], off_w3=offs["w3"],
        n_out=num_speakers)

    out = pl.pallas_call(
        kernel,
        out_shape=jax.ShapeDtypeStruct((b_pad, num_speakers), jnp.float32),
        grid=(n_tiles,),
        in_specs=[
            pl.BlockSpec((tm, input_size), lambda i: (i, 0)),   # streamed batch tiles
            # Constant index_map: Pallas elides re-DMA after step 0 -> slabs
            # stay VMEM-resident across all tiles.
            pl.BlockSpec(wslab.shape, lambda i: (0, 0)),
            pl.BlockSpec(bslab.shape, lambda i: (0, 0)),
        ],
        out_specs=pl.BlockSpec((tm, num_speakers), lambda i: (i, 0)),
        compiler_params=pltpu.CompilerParams(
            dimension_semantics=("parallel",),          # shard tiles across v7x TCs
            vmem_limit_bytes=32 * 1024 * 1024),         # explicit (v5e default 16 MiB)
    )(x, wslab, bslab)
    return out[:B] if pad else out


def init_params(key, input_size, hidden_size, num_speakers):
    """nn.Linear-style init (uniform +-1/sqrt(fan_in)); weights stored as [in, out]."""
    ks = jax.random.split(key, 6)

    def lin(kw, kb, fan_in, fan_out):
        bound = 1.0 / jnp.sqrt(jnp.float32(fan_in))
        w = jax.random.uniform(kw, (fan_in, fan_out), jnp.float32, -bound, bound)
        b = jax.random.uniform(kb, (1, fan_out), jnp.float32, -bound, bound)
        return w, b

    w1, b1 = lin(ks[0], ks[1], input_size, hidden_size)
    w2, b2 = lin(ks[2], ks[3], hidden_size, hidden_size // 2)
    w3, b3 = lin(ks[4], ks[5], hidden_size // 2, num_speakers)
    return {"w1": w1, "b1": b1, "w2": w2, "b2": b2, "w3": w3, "b3": b3}


def _reference(x, params):
    """Mirror of the kernel math (bf16 weights/activations, f32 biases/accum)."""
    bf = lambda a: a.astype(jnp.bfloat16)
    h1 = jnp.maximum(
        jnp.dot(bf(x), bf(params["w1"]), preferred_element_type=jnp.float32)
        + params["b1"], 0.0)
    h2 = jnp.maximum(
        jnp.dot(bf(h1), bf(params["w2"]), preferred_element_type=jnp.float32)
        + params["b2"], 0.0)
    return (jnp.dot(bf(h2), bf(params["w3"]), preferred_element_type=jnp.float32)
            + params["b3"])


if __name__ == "__main__":
    batch = 512          # -> tm=256, 2 tiles (even count: both v7x TCs busy)
    input_size = 40      # MFCC-like feature width
    hidden_size = 32
    num_speakers = 5

    key = jax.random.PRNGKey(0)
    kx, kp = jax.random.split(key)
    x = jax.random.normal(kx, (batch, input_size), jnp.float32)
    params = init_params(kp, input_size, hidden_size, num_speakers)
    wslab, bslab, offs = pack_params(params, input_size, hidden_size, num_speakers)

    out = speaker_recognition_forward(
        x, wslab, bslab, offs, input_size=input_size, num_speakers=num_speakers)
    out = jax.block_until_ready(out)

    ref = _reference(x, params)
    assert out.shape == (batch, num_speakers)
    assert jnp.allclose(out, ref, atol=1e-2, rtol=1e-2), (
        float(jnp.max(jnp.abs(out - ref))))

    print("KERNEL_OK")
</pallas_src>

<mosaic_0001>
module attributes {stable_mosaic.version = 11 : i64} {
  func.func @_mlp_kernel(%arg0: i32, %arg1: memref<256x40xf32, #tpu.memory_space<vmem>>, %arg2: memref<304x128xbf16, #tpu.memory_space<vmem>>, %arg3: memref<8x128xf32, #tpu.memory_space<vmem>>, %arg4: memref<256x5xf32, #tpu.memory_space<vmem>>) attributes {dimension_semantics = [#tpu.dimension_semantics<parallel>], iteration_bounds = array<i64: 2>, scalar_prefetch = 0 : i64, scratch_operands = 0 : i64, tpu.core_type = #tpu.core_type<tc>, window_params = [{transform_indices = @transform_0, window_bounds = array<i64: 256, 40>}, {pipeline_mode = #tpu.pipeline_mode<synchronous>, transform_indices = @transform_1, window_bounds = array<i64: 304, 128>}, {pipeline_mode = #tpu.pipeline_mode<synchronous>, transform_indices = @transform_2, window_bounds = array<i64: 8, 128>}, {transform_indices = @transform_3, window_bounds = array<i64: 256, 5>}]} {
    %c0 = arith.constant 0 : index
    %c0_0 = arith.constant 0 : index
    %0 = vector.load %arg1[%c0, %c0_0] : memref<256x40xf32, #tpu.memory_space<vmem>>, vector<256x40xf32>
    %1 = arith.truncf %0 : vector<256x40xf32> to vector<256x40xbf16>
    %cst = arith.constant 0.000000e+00 : bf16
    %2 = vector.broadcast %cst : bf16 to vector<256x8xbf16>
    %3 = tpu.concatenate %1, %2 in 1 : vector<256x40xbf16>, vector<256x8xbf16> -> vector<256x48xbf16>
    %c0_1 = arith.constant 0 : index
    %c0_2 = arith.constant 0 : index
    %4 = vector.load %arg2[%c0_1, %c0_2] : memref<304x128xbf16, #tpu.memory_space<vmem>>, vector<48x128xbf16>
    %c0_3 = arith.constant 0 : index
    %c0_4 = arith.constant 0 : index
    %5 = vector.load %arg3[%c0_3, %c0_4] : memref<8x128xf32, #tpu.memory_space<vmem>>, vector<1x128xf32>
    %cst_5 = arith.constant dense<0.000000e+00> : vector<256x128xf32>
    %6 = tpu.matmul %3, %4, %cst_5 {dimension_numbers = #tpu.dot_dimension_numbers<[1], [0], [0], [1], [0, 0, 1, 1], [], []>} : vector<256x48xbf16>, vector<48x128xbf16>, vector<256x128xf32> -> vector<256x128xf32>
    %7 = vector.broadcast %5 : vector<1x128xf32> to vector<256x128xf32>
    %8 = arith.addf %6, %7 : vector<256x128xf32>
    %cst_6 = arith.constant 0.000000e+00 : f32
    %9 = vector.broadcast %cst_6 : f32 to vector<256x128xf32>
    %10 = arith.maximumf %8, %9 : vector<256x128xf32>
    %c48 = arith.constant 48 : index
    %c0_7 = arith.constant 0 : index
    %11 = vector.load %arg2[%c48, %c0_7] : memref<304x128xbf16, #tpu.memory_space<vmem>>, vector<128x128xbf16>
    %c1 = arith.constant 1 : index
    %c0_8 = arith.constant 0 : index
    %12 = vector.load %arg3[%c1, %c0_8] : memref<8x128xf32, #tpu.memory_space<vmem>>, vector<1x128xf32>
    %13 = arith.truncf %10 : vector<256x128xf32> to vector<256x128xbf16>
    %cst_9 = arith.constant dense<0.000000e+00> : vector<256x128xf32>
    %14 = tpu.matmul %13, %11, %cst_9 {dimension_numbers = #tpu.dot_dimension_numbers<[1], [0], [0], [1], [0, 0, 1, 1], [], []>} : vector<256x128xbf16>, vector<128x128xbf16>, vector<256x128xf32> -> vector<256x128xf32>
    %15 = vector.broadcast %12 : vector<1x128xf32> to vector<256x128xf32>
    %16 = arith.addf %14, %15 : vector<256x128xf32>
    %cst_10 = arith.constant 0.000000e+00 : f32
    %17 = vector.broadcast %cst_10 : f32 to vector<256x128xf32>
    %18 = arith.maximumf %16, %17 : vector<256x128xf32>
    %c176 = arith.constant 176 : index
    %c0_11 = arith.constant 0 : index
    %19 = vector.load %arg2[%c176, %c0_11] : memref<304x128xbf16, #tpu.memory_space<vmem>>, vector<128x128xbf16>
    %c2 = arith.constant 2 : index
    %c0_12 = arith.constant 0 : index
    %20 = vector.load %arg3[%c2, %c0_12] : memref<8x128xf32, #tpu.memory_space<vmem>>, vector<1x128xf32>
    %21 = arith.truncf %18 : vector<256x128xf32> to vector<256x128xbf16>
    %cst_13 = arith.constant dense<0.000000e+00> : vector<256x128xf32>
    %22 = tpu.matmul %21, %19, %cst_13 {dimension_numbers = #tpu.dot_dimension_numbers<[1], [0], [0], [1], [0, 0, 1, 1], [], []>} : vector<256x128xbf16>, vector<128x128xbf16>, vector<256x128xf32> -> vector<256x128xf32>
    %23 = vector.broadcast %20 : vector<1x128xf32> to vector<256x128xf32>
    %24 = arith.addf %22, %23 : vector<256x128xf32>
    %25 = vector.extract_strided_slice %24 {offsets = [0, 0], sizes = [256, 5], strides = [1, 1]} : vector<256x128xf32> to vector<256x5xf32>
    %c0_14 = arith.constant 0 : index
    %c0_15 = arith.constant 0 : index
    %26 = vector.load %arg4[%c0_14, %c0_15] : memref<256x5xf32, #tpu.memory_space<vmem>>, vector<256x5xf32>
    tpu.vector_store %arg4[%c0_14, %c0_15], %25 {strides = array<i32>} : memref<256x5xf32, #tpu.memory_space<vmem>>, vector<256x5xf32>,
    return
  }
  func.func @transform_0(%arg0: i32) -> (i32, i32) {
    %c0_i32 = arith.constant 0 : i32
    %c0_i32_0 = arith.constant 0 : i32
    return %arg0, %c0_i32 : i32, i32
  }
  func.func @transform_1(%arg0: i32) -> (i32, i32) {
    %c0_i32 = arith.constant 0 : i32
    %c0_i32_0 = arith.constant 0 : i32
    %c0_i32_1 = arith.constant 0 : i32
    return %c0_i32, %c0_i32_0 : i32, i32
  }
  func.func @transform_2(%arg0: i32) -> (i32, i32) {
    %c0_i32 = arith.constant 0 : i32
    %c0_i32_0 = arith.constant 0 : i32
    %c0_i32_1 = arith.constant 0 : i32
    return %c0_i32, %c0_i32_0 : i32, i32
  }
  func.func @transform_3(%arg0: i32) -> (i32, i32) {
    %c0_i32 = arith.constant 0 : i32
    %c0_i32_0 = arith.constant 0 : i32
    return %arg0, %c0_i32 : i32, i32
  }
}

</mosaic_0001>

<bundles_post_ra>
// kernel: tpu_custom_call.1
= control target key start
LH: loop header
LB: loop body
LE: loop exit
PB: predicated region body
PF: predicated region fallthrough
CT: control target
= control target key end

     0   :  { %s1436_s12 = smov 0   ;;  %s1766_s0 = inlined_call_operand.vmem [shape: f32[512,40], index: 0, kind: input, shape index: {}]   ;;  %s1767_s1 = inlined_call_operand.vmem [shape: bf16[304,128], index: 1, kind: input, shape index: {}]   ;;  %s1768_s2 = inlined_call_operand.vmem [shape: f32[8,128], index: 2, kind: input, shape index: {}]   ;;  %s1769_s3 = inlined_call_operand.vmem [shape: f32[512,5], index: 3, kind: output, shape index: {}]  }
   0x1 LB: > { %s1125_s13 = sadd.s32 4294967295, %s1414_s12   ;;  %p1129_p0 = scmp.ge.s32.totalorder %s1414_s12, 1  ;;  %s1414_s12 = sphi %s1436_s12, %s13_s12  }
   0x2   : > { %p138_p1 = scmp.lt.s32.totalorder %s1414_s12, 3 }
   0x4   : > { %p139_p2 = pnand %p1129_p0, %p138_p1 }
   0x5   : > { %v1389_v0 = vld [vmem:[%s1767_s1] sm:$0xff] (!%p139_p2)   ;;  %s1130_s16 = sshll.u32 (!%p139_p2), %s1125_s13, 5  ;;  %v1390_v1 = vld [vmem:[%s1767_s1 + $0x8] sm:$0xff] (!%p139_p2)   ;;  %v1391_v2 = vld [vmem:[%s1767_s1 + $0x10] sm:$0xff] (!%p139_p2)   ;;  %vm223_vm0 = vcmask (!%p139_p2), 326656   ;;  %vm286_vm1 = vcmask (!%p139_p2), 392192  }
   0x6   : > { %142 = sbr.rel (%p139_p2) target bundleno = 739 (0x2e3), region = 32  ;;  %p163_p3 = scmp.lt.s32.totalorder (!%p139_p2), %s1130_s16, 63  ;;  %1241 = vmatprep.subr.bf16.mxu0 (!%p139_p2), %v1389_v0  ;;  %1375 = vmatprep.subr.bf16.mxu1 (!%p139_p2), %v1389_v0  ;;  %v1392_v12 = vld [vmem:[%s1767_s1 + $0x18] sm:$0xff] (!%p139_p2)   ;;  %v1393_v36 = vld [vmem:[%s1767_s1 + $0x20] sm:$0xff] (!%p139_p2)   ;;  %v1394_v41 = vld [vmem:[%s1767_s1 + $0x28] sm:$0xff] (!%p139_p2)   ;;  %vm1036_vm2 = vcmask (!%p139_p2), 39936  }
   0x7   : > { %1242 = vmatpush3.bf16.msra.mxu0 (!%p139_p2), %v1389_v0  ;;  %1378 = vmatpush3.bf16.msra.mxu1 (!%p139_p2), %v1389_v0  ;;  %v1395_v52 = vld [vmem:[%s1767_s1 + $0x30] sm:$0xff] (!%p139_p2)   ;;  %v1396_v60 = vld [vmem:[%s1767_s1 + $0x38] sm:$0xff] (!%p139_p2)  }
   0x8   : > { %1243 = vmatprep.subr.bf16.mxu0 (!%p139_p2), %v1390_v1  ;;  %1376 = vmatprep.subr.bf16.mxu1 (!%p139_p2), %v1390_v1 }
   0xb   : > { %1244 = vmatpush3.bf16.msra.mxu0 (!%p139_p2), %v1390_v1  ;;  %1379 = vmatpush3.bf16.msra.mxu1 (!%p139_p2), %v1390_v1 }
   0xc   : > { %1245 = vmatprep.subr.bf16.mxu0 (!%p139_p2), %v1391_v2  ;;  %1377 = vmatprep.subr.bf16.mxu1 (!%p139_p2), %v1391_v2 }
   0xd   : > { %s1771_s16 = smov (!%p163_p3, %s1130_s16), 63 }
   0xe   : > { %s1131_s21 = sshll.u32 %s1771_s16, 3 }
   0xf   : > { %s1461_s24 = scalar_lea.vmem %s1766_s0, %s1131_s21  ;;  %1246 = vmatpush3.bf16.msra.mxu0 %v1391_v2  ;;  %1380 = vmatpush3.bf16.msra.mxu1 %v1391_v2  ;;  %s1665_s15 = scalar_lea.vmem %s1769_s3, %s1131_s21 }
  0x10   : > { %v175_v3 = vld [vmem:[%s1461_s24] sm:$0xff]  ;;  %v176_v4 = vld [vmem:[%s1461_s24 + $0x8] sm:$0xff]  ;;  %v177_v5 = vld [vmem:[%s1461_s24 + $0x10] sm:$0xff]  ;;  %1279 = vmatprep.subr.bf16.mxu1 %v1392_v12 }
  0x11   : > { %v207_v6 = vpack.c.bf16 %v176_v4, %v175_v3  ;;  %v178_v7 = vld [vmem:[%s1461_s24 + $0x18] sm:$0xff]  ;;  %v179_v8 = vld [vmem:[%s1461_s24 + $0x20] sm:$0xff]  ;;  %v180_v9 = vld [vmem:[%s1461_s24 + $0x28] sm:$0xff] }
  0x12   : > { %v208_v10 = vpack.c.bf16 %v178_v7, %v177_v5  ;;  %v209_v11 = vpack.c.bf16 %v180_v9, %v179_v8  ;;  %v181_v15 = vld [vmem:[%s1461_s24 + $0x30] sm:$0xff]  ;;  %v182_v16 = vld [vmem:[%s1461_s24 + $0x38] sm:$0xff]  ;;  %v183_v17 = vld [vmem:[%s1461_s24 + $0x40] sm:$0xff] }
  0x13   : > { %v226_v13 = vsel %vm223_vm0, %v207_v6, 0  ;;  %v184_v19 = vld [vmem:[%s1461_s24 + $0x48] sm:$0xff]  ;;  %v191_v20 = vld [vmem:[%s1461_s24 + $0x80] sm:$0xff]  ;;  %v193_v23 = vld [vmem:[%s1461_s24 + $0x90] sm:$0xff]  ;;  %v210_v30 = vpack.c.bf16 %v182_v16, %v181_v15 }
  0x14   : > { %1247 = vmatprep.mubr.msk.bf16.mxu0 %vm286_vm1, %v226_v13  ;;  %v228_v14 = vsel %vm223_vm0, %v208_v10, 0  ;;  %v230_v18 = vsel %vm223_vm0, %v209_v11, 0  ;;  %v192_v21 = vld [vmem:[%s1461_s24 + $0x88] sm:$0xff]  ;;  %v194_v24 = vld [vmem:[%s1461_s24 + $0x98] sm:$0xff]  ;;  %v195_v25 = vld [vmem:[%s1461_s24 + $0xa0] sm:$0xff]  ;;  %v211_v31 = vpack.c.bf16 %v184_v19, %v183_v17 }
  0x15   : > { %v215_v22 = vpack.c.bf16 %v192_v21, %v191_v20  ;;  %1248 = vmatmul.mubr.msk.bf16.vlgmr.msra.gmra.mrb[0].mxu0 %vm286_vm1, %v228_v14  ;;  %v216_v26 = vpack.c.bf16 %v194_v24, %v193_v23  ;;  %v196_v27 = vld [vmem:[%s1461_s24 + $0xa8] sm:$0xff]  ;;  %v197_v28 = vld [vmem:[%s1461_s24 + $0xb0] sm:$0xff]  ;;  %v198_v29 = vld [vmem:[%s1461_s24 + $0xb8] sm:$0xff]  ;;  %v232_v44 = vsel %vm223_vm0, %v210_v30, 0 }
  0x16   : > { %1251 = vmatprep.mubr.msk.bf16.mxu0 %vm286_vm1, %v230_v18  ;;  %v217_v33 = vpack.c.bf16 %v196_v27, %v195_v25  ;;  %v199_v34 = vld [vmem:[%s1461_s24 + $0xc0] sm:$0xff]  ;;  %v200_v35 = vld [vmem:[%s1461_s24 + $0xc8] sm:$0xff]  ;;  %v218_v38 = vpack.c.bf16 %v198_v29, %v197_v28  ;;  %v185_v42 = vld [vmem:[%s1461_s24 + $0x50] sm:$0xff]  ;;  %v234_v45 = vsel %vm223_vm0, %v211_v31, 0 }
  0x17   : > { %v242_v32 = vsel %vm223_vm0, %v215_v22, 0  ;;  %v244_v37 = vsel %vm223_vm0, %v216_v26, 0  ;;  %v219_v39 = vpack.c.bf16 %v200_v35, %v199_v34  ;;  %v186_v43 = vld [vmem:[%s1461_s24 + $0x58] sm:$0xff]  ;;  %v187_v46 = vld [vmem:[%s1461_s24 + $0x60] sm:$0xff]  ;;  %v188_v47 = vld [vmem:[%s1461_s24 + $0x68] sm:$0xff] }
  0x18   : > { %1263 = vmatprep.mubr.msk.bf16.mxu1 %vm286_vm1, %v242_v32  ;;  %v246_v40 = vsel %vm223_vm0, %v217_v33, 0  ;;  %v248_v48 = vsel %vm223_vm0, %v218_v38, 0  ;;  %v201_v50 = vld [vmem:[%s1461_s24 + $0xd0] sm:$0xff]  ;;  %v202_v51 = vld [vmem:[%s1461_s24 + $0xd8] sm:$0xff]  ;;  %v203_v53 = vld [vmem:[%s1461_s24 + $0xe0] sm:$0xff]  ;;  %v212_v55 = vpack.c.bf16 %v186_v43, %v185_v42  ;;  %v213_v56 = vpack.c.bf16 %v188_v47, %v187_v46 }
  0x19   : > { %1264 = vmatmul.mubr.msk.bf16.vlgmr.msra.gmra.mrb[0].mxu1 %vm286_vm1, %v244_v37  ;;  %v250_v49 = vsel %vm223_vm0, %v219_v39, 0  ;;  %v204_v54 = vld [vmem:[%s1461_s24 + $0xe8] sm:$0xff]  ;;  %v220_v57 = vpack.c.bf16 %v202_v51, %v201_v50  ;;  %v189_v62 = vld [vmem:[%s1461_s24 + $0x70] sm:$0xff]  ;;  %v190_v63 = vld [vmem:[%s1461_s24 + $0x78] sm:$0xff] }
  0x1a   : > { %1267 = vmatprep.mubr.msk.bf16.mxu1 %vm286_vm1, %v246_v40  ;;  %1280 = vmatpush3.bf16.msra.mxu1 %v1392_v12  ;;  %v236_v58 = vsel %vm223_vm0, %v212_v55, 0  ;;  %v221_v59 = vpack.c.bf16 %v204_v54, %v203_v53  ;;  %v238_v61 = vsel %vm223_vm0, %v213_v56, 0  ;;  %v214_v1 = vpack.c.bf16 %v190_v63, %v189_v62  ;;  %v205_v3 = vld [vmem:[%s1461_s24 + $0xf0] sm:$0xff]  ;;  %v206_v4 = vld [vmem:[%s1461_s24 + $0xf8] sm:$0xff]  ;;  %v1397_v5 = vld [vmem:[%s1767_s1 + $0x40] sm:$0xff]  }
  0x1b   : > { %1281 = vmatprep.subr.bf16.mxu1 %v1393_v36  ;;  %v252_v0 = vsel %vm223_vm0, %v220_v57, 0  ;;  %v222_v6 = vpack.c.bf16 %v206_v4, %v205_v3  ;;  %v1398_v9 = vld [vmem:[%s1767_s1 + $0x48] sm:$0xff]   ;;  %v1399_v10 = vld [vmem:[%s1767_s1 + $0x50] sm:$0xff]   ;;  %v1400_v11 = vld [vmem:[%s1767_s1 + $0x58] sm:$0xff]  }
  0x1c   : > { %v254_v2 = vsel %vm223_vm0, %v221_v59, 0  ;;  %v240_v7 = vsel %vm223_vm0, %v214_v1, 0  ;;  %v1401_v12 = vld [vmem:[%s1767_s1 + $0x60] sm:$0xff]   ;;  %1327 = vmatprep.subr.bf16.mxu0 %v1400_v11  ;;  %v1402_v13 = vld [vmem:[%s1767_s1 + $0x68] sm:$0xff]   ;;  %v1403_v14 = vld [vmem:[%s1767_s1 + $0x70] sm:$0xff]  }
  0x1d   : > { %1252 = vmatmul.mubr.msk.bf16.gmra.mrb[4].mxu0 %vm286_vm1, %v232_v44  ;;  %v256_v8 = vsel %vm223_vm0, %v222_v6, 0  ;;  %v1404_v15 = vld [vmem:[%s1767_s1 + $0x78] sm:$0xff]   ;;  %v1405_v16 = vld [vmem:[%s1767_s1 + $0x80] sm:$0xff]  }
  0x1e   : > { %1282 = vmatpush3.bf16.msra.mxu1 %v1393_v36  ;;  %1255 = vmatprep.mubr.msk.bf16.mxu0 %vm286_vm1, %v234_v45  ;;  %v1572_v17 = vld [vmem:[%s1768_s2] ss:$0 sm:$0xff] }
  0x1f   : > { %1283 = vmatprep.subr.bf16.mxu1 %v1394_v41  ;;  %1328 = vmatpush3.bf16.msra.mxu0 %v1400_v11 }
  0x20   : > { %1329 = vmatprep.subr.bf16.mxu0 %v1401_v12 }
  0x21   : > { %1268 = vmatmul.mubr.msk.bf16.gmra.mrb[4].mxu1 %vm286_vm1, %v248_v48 }
  0x22   : > { %1271 = vmatprep.mubr.msk.bf16.mxu1 %vm286_vm1, %v250_v49  ;;  %1284 = vmatpush3.bf16.msra.mxu1 %v1394_v41 }
  0x23   : > { %1285 = vmatprep.subr.bf16.mxu1 %v1395_v52  ;;  %1330 = vmatpush3.bf16.msra.mxu0 %v1401_v12 }
  0x24   : > { %1331 = vmatprep.subr.bf16.mxu0 %v1402_v13 }
  0x25   : > { %1256 = vmatmul.mubr.msk.bf16.gmra.mrb[8].mxu0 %vm286_vm1, %v236_v58 }
  0x26   : > { %1286 = vmatpush3.bf16.msra.mxu1 %v1395_v52  ;;  %1259 = vmatprep.mubr.msk.bf16.mxu0 %vm286_vm1, %v238_v61 }
  0x27   : > { %1287 = vmatprep.subr.bf16.mxu1 %v1396_v60  ;;  %1332 = vmatpush3.bf16.msra.mxu0 %v1402_v13 }
  0x28   : > { %1333 = vmatprep.subr.bf16.mxu0 %v1403_v14 }
  0x29   : > { %1272 = vmatmul.mubr.msk.bf16.gmra.mrb[8].mxu1 %vm286_vm1, %v252_v0 }
  0x2a   : > { %1275 = vmatprep.mubr.msk.bf16.mxu1 %vm286_vm1, %v254_v2  ;;  %1288 = vmatpush3.bf16.msra.mxu1 %v1396_v60 }
  0x2b   : > { %1289 = vmatprep.subr.bf16.mxu1 %v1397_v5  ;;  %1334 = vmatpush3.bf16.msra.mxu0 %v1403_v14 }
  0x2c   : > { %1335 = vmatprep.subr.bf16.mxu0 %v1404_v15 }
  0x2d   : > { %1260 = vmatmul.mubr.msk.bf16.gmra.mrb[12].mxu0 %vm286_vm1, %v240_v7 }
  0x2e   : > { %1290 = vmatpush3.bf16.msra.mxu1 %v1397_v5 }
  0x2f   : > { %1291 = vmatprep.subr.bf16.mxu1 %v1398_v9  ;;  %1336 = vmatpush3.bf16.msra.mxu0 %v1404_v15 }
  0x30   : > { %1337 = vmatprep.subr.bf16.mxu0 %v1405_v16 }
  0x31   : > { %1276 = vmatmul.mubr.msk.bf16.gmra.mrb[12].mxu1 %vm286_vm1, %v256_v8 }
  0x32   : > { %1292 = vmatpush3.bf16.msra.mxu1 %v1398_v9 }
  0x33   : > { %1293 = vmatprep.subr.bf16.mxu1 %v1399_v10  ;;  %1338 = vmatpush3.bf16.msra.mxu0 %v1405_v16 }
  0x36   : > { %1294 = vmatpush3.bf16.msra.mxu1 %v1399_v10 }
  0xe8   : > { %v1249_v18 = vpop.f32.mrb[0].mxu0 }
  0xe9   : > { %v362_v19 = vadd.f32 %v1249_v18, %v1572_v17  ;;  %v353_v20 = vpop.f32.mrb[1].mxu0 }
  0xea   : > { %v354_v21 = vadd.f32 %v1572_v17, %v353_v20  ;;  %v1250_v22 = vpop.f32.mrb[2].mxu0 }
  0xeb   : > { %v365_v23 = vadd.f32 %v1250_v22, %v1572_v17  ;;  %v356_v24 = vpop.f32.mrb[3].mxu0  ;;  %v482_v29 = vmax.f32 %v362_v19, 0.0 }
  0xec   : > { %v1265_v25 = vpop.f32.mrb[0].mxu1  ;;  %v357_v26 = vadd.f32 %v1572_v17, %v356_v24  ;;  %v480_v33 = vmax.f32 %v354_v21, 0.0 }
  0xed   : > { %v426_v27 = vadd.f32 %v1265_v25, %v1572_v17  ;;  %v417_v28 = vpop.f32.mrb[1].mxu1  ;;  %v483_v30 = vmax.f32 %v365_v23, 0.0 }
  0xee   : > { %v418_v31 = vadd.f32 %v1572_v17, %v417_v28  ;;  %v1266_v32 = vpop.f32.mrb[2].mxu1  ;;  %v481_v34 = vmax.f32 %v357_v26, 0.0 }
  0xef   : > { %v498_v35 = vmax.f32 %v426_v27, 0.0  ;;  %v429_v36 = vadd.f32 %v1266_v32, %v1572_v17  ;;  %v420_v37 = vpop.f32.mrb[3].mxu1  ;;  %v530_v38 = vpack.c.bf16 %v483_v30, %v482_v29 }
  0xf0   : > { %v496_v39 = vmax.f32 %v418_v31, 0.0  ;;  %v421_v40 = vadd.f32 %v1572_v17, %v420_v37  ;;  %v529_v41 = vpack.c.bf16 %v481_v34, %v480_v33  ;;  %v1253_v42 = vpop.f32.mrb[4].mxu0 }
  0xf1   : > { %v499_v43 = vmax.f32 %v429_v36, 0.0  ;;  %v378_v44 = vadd.f32 %v1253_v42, %v1572_v17  ;;  %v369_v45 = vpop.f32.mrb[5].mxu0 }
  0xf2   : > { %v497_v46 = vmax.f32 %v421_v40, 0.0  ;;  %v370_v47 = vadd.f32 %v1572_v17, %v369_v45  ;;  %v1254_v48 = vpop.f32.mrb[6].mxu0  ;;  %1295 = vmatprep.mubr.bf16.mxu1 %v529_v41 }
  0xf3   : > { %v1584_v49 = vpack.c.bf16 %v499_v43, %v498_v35  ;;  %v381_v50 = vadd.f32 %v1254_v48, %v1572_v17  ;;  %v372_v51 = vpop.f32.mrb[7].mxu0  ;;  %1296 = vmatmul.mubr.bf16.vlgmr.msra.gmra.mrb[16].mxu1 %v530_v38  ;;  %v486_v57 = vmax.f32 %v378_v44, 0.0 }
  0xf4   : > { %v1587_v52 = vpack.c.bf16 %v497_v46, %v496_v39  ;;  %v1269_v53 = vpop.f32.mrb[4].mxu1  ;;  %v373_v54 = vadd.f32 %v1572_v17, %v372_v51  ;;  %v484_v61 = vmax.f32 %v370_v47, 0.0 }
  0xf5   : > { %v442_v55 = vadd.f32 %v1269_v53, %v1572_v17  ;;  %v433_v56 = vpop.f32.mrb[5].mxu1  ;;  %v487_v58 = vmax.f32 %v381_v50, 0.0 }
  0xf6   : > { %v434_v59 = vadd.f32 %v1572_v17, %v433_v56  ;;  %v1270_v60 = vpop.f32.mrb[6].mxu1  ;;  %v485_v62 = vmax.f32 %v373_v54, 0.0 }
  0xf7   : > { %v502_v63 = vmax.f32 %v442_v55, 0.0  ;;  %v445_v0 = vadd.f32 %v1270_v60, %v1572_v17  ;;  %v436_v1 = vpop.f32.mrb[7].mxu1  ;;  %v532_v2 = vpack.c.bf16 %v487_v58, %v486_v57 }
  0xf8   : > { %v500_v3 = vmax.f32 %v434_v59, 0.0  ;;  %v437_v4 = vadd.f32 %v1572_v17, %v436_v1  ;;  %v531_v5 = vpack.c.bf16 %v485_v62, %v484_v61  ;;  %v1257_v6 = vpop.f32.mrb[8].mxu0 }
  0xf9   : > { %v503_v7 = vmax.f32 %v445_v0, 0.0  ;;  %v394_v8 = vadd.f32 %v1257_v6, %v1572_v17  ;;  %v385_v9 = vpop.f32.mrb[9].mxu0 }
  0xfa   : > { %v501_v10 = vmax.f32 %v437_v4, 0.0  ;;  %v386_v11 = vadd.f32 %v1572_v17, %v385_v9  ;;  %v1258_v12 = vpop.f32.mrb[10].mxu0  ;;  %1299 = vmatprep.mubr.bf16.mxu1 %v531_v5  ;;  %v1407_v5 = vld [vmem:[%s1767_s1 + $0x90] sm:$0xff]  }
  0xfb   : > { %v540_v13 = vpack.c.bf16 %v503_v7, %v502_v63  ;;  %v397_v14 = vadd.f32 %v1258_v12, %v1572_v17  ;;  %v388_v15 = vpop.f32.mrb[11].mxu0  ;;  %1300 = vmatmul.mubr.bf16.gmra.mrb[20].mxu1 %v532_v2  ;;  %v490_v22 = vmax.f32 %v394_v8, 0.0 }
  0xfc   : > { %v539_v16 = vpack.c.bf16 %v501_v10, %v500_v3  ;;  %v1273_v18 = vpop.f32.mrb[8].mxu1  ;;  %v389_v19 = vadd.f32 %v1572_v17, %v388_v15  ;;  %v488_v26 = vmax.f32 %v386_v11, 0.0 }
  0xfd   : > { %v458_v20 = vadd.f32 %v1273_v18, %v1572_v17  ;;  %v449_v21 = vpop.f32.mrb[9].mxu1  ;;  %v491_v23 = vmax.f32 %v397_v14, 0.0 }
  0xfe   : > { %v450_v24 = vadd.f32 %v1572_v17, %v449_v21  ;;  %v1274_v25 = vpop.f32.mrb[10].mxu1  ;;  %v489_v27 = vmax.f32 %v389_v19, 0.0 }
  0xff   : > { %v506_v28 = vmax.f32 %v458_v20, 0.0  ;;  %v461_v29 = vadd.f32 %v1274_v25, %v1572_v17  ;;  %v452_v30 = vpop.f32.mrb[11].mxu1  ;;  %v534_v31 = vpack.c.bf16 %v491_v23, %v490_v22 }
 0x100   : > { %v504_v32 = vmax.f32 %v450_v24, 0.0  ;;  %v453_v33 = vadd.f32 %v1572_v17, %v452_v30  ;;  %v533_v34 = vpack.c.bf16 %v489_v27, %v488_v26  ;;  %v1261_v35 = vpop.f32.mrb[12].mxu0 }
 0x101   : > { %v507_v36 = vmax.f32 %v461_v29, 0.0  ;;  %v410_v37 = vadd.f32 %v1261_v35, %v1572_v17  ;;  %v401_v38 = vpop.f32.mrb[13].mxu0 }
 0x102   : > { %v505_v39 = vmax.f32 %v453_v33, 0.0  ;;  %v402_v40 = vadd.f32 %v1572_v17, %v401_v38  ;;  %v1262_v41 = vpop.f32.mrb[14].mxu0  ;;  %1303 = vmatprep.mubr.bf16.mxu1 %v533_v34 }
 0x103   : > { %v542_v42 = vpack.c.bf16 %v507_v36, %v506_v28  ;;  %v413_v43 = vadd.f32 %v1262_v41, %v1572_v17  ;;  %v404_v44 = vpop.f32.mrb[15].mxu0  ;;  %1304 = vmatmul.mubr.bf16.gmra.mrb[24].mxu1 %v534_v31  ;;  %v494_v51 = vmax.f32 %v410_v37, 0.0 }
 0x104   : > { %v541_v45 = vpack.c.bf16 %v505_v39, %v504_v32  ;;  %v1277_v46 = vpop.f32.mrb[12].mxu1  ;;  %v405_v47 = vadd.f32 %v1572_v17, %v404_v44  ;;  %v492_v56 = vmax.f32 %v402_v40, 0.0 }
 0x105   : > { %v474_v48 = vadd.f32 %v1277_v46, %v1572_v17  ;;  %v465_v50 = vpop.f32.mrb[13].mxu1  ;;  %v495_v53 = vmax.f32 %v413_v43, 0.0 }
 0x106   : > { %v466_v54 = vadd.f32 %v1572_v17, %v465_v50  ;;  %v1278_v55 = vpop.f32.mrb[14].mxu1  ;;  %v493_v57 = vmax.f32 %v405_v47, 0.0 }
 0x107   : > { %v510_v58 = vmax.f32 %v474_v48, 0.0  ;;  %v477_v59 = vadd.f32 %v1278_v55, %v1572_v17  ;;  %v468_v60 = vpop.f32.mrb[15].mxu1  ;;  %v536_v61 = vpack.c.bf16 %v495_v53, %v494_v51 }
 0x108   : > { %v508_v62 = vmax.f32 %v466_v54, 0.0  ;;  %v469_v63 = vadd.f32 %v1572_v17, %v468_v60  ;;  %v535_v0 = vpack.c.bf16 %v493_v57, %v492_v56  ;;  %v1406_v17 = vld [vmem:[%s1767_s1 + $0x88] sm:$0xff]  }
 0x109   : > { %v511_v1 = vmax.f32 %v477_v59, 0.0  ;;  %1339 = vmatprep.subr.bf16.mxu0 %v1406_v17 }
 0x10a   : > { %v509_v2 = vmax.f32 %v469_v63, 0.0  ;;  %1307 = vmatprep.mubr.bf16.mxu1 %v535_v0  ;;  %1340 = vmatpush3.bf16.msra.mxu0 %v1406_v17 }
 0x10b   : > { %v544_v3 = vpack.c.bf16 %v511_v1, %v510_v58  ;;  %1308 = vmatmul.mubr.bf16.gmra.mrb[28].mxu1 %v536_v61  ;;  %1341 = vmatprep.subr.bf16.mxu0 %v1407_v5 }
 0x10c   : > { %v543_v4 = vpack.c.bf16 %v509_v2, %v508_v62  ;;  %1311 = vmatprep.mubr.bf16.mxu1 %v1587_v52 }
 0x10e   : > { %1342 = vmatpush3.bf16.msra.mxu0 %v1407_v5 }
 0x113   : > { %1312 = vmatmul.mubr.bf16.gmra.mrb[32].mxu1 %v1584_v49  ;;  %v1621_v49 = vld [vmem:[%s1768_s2 + $0x1] ss:$0 sm:$0xff] }
 0x114   : > { %1315 = vmatprep.mubr.bf16.mxu1 %v539_v16 }
 0x11b   : > { %1316 = vmatmul.mubr.bf16.gmra.mrb[36].mxu1 %v540_v13 }
 0x11c   : > { %1319 = vmatprep.mubr.bf16.mxu1 %v541_v45 }
 0x123   : > { %1320 = vmatmul.mubr.bf16.gmra.mrb[40].mxu1 %v542_v42 }
 0x124   : > { %1323 = vmatprep.mubr.bf16.mxu1 %v543_v4 }
 0x12b   : > { %1324 = vmatmul.mubr.bf16.gmra.mrb[44].mxu1 %v544_v3 }
 0x1c6   : > { %v1297_v52 = vpop.f32.mrb[16].mxu1 }
 0x1c7   : > { %v640_v6 = vadd.f32 %v1297_v52, %v1621_v49  ;;  %v631_v7 = vpop.f32.mrb[17].mxu1 }
 0x1c8   : > { %v632_v8 = vadd.f32 %v1621_v49, %v631_v7  ;;  %v1298_v9 = vpop.f32.mrb[18].mxu1 }
 0x1c9   : > { %v643_v10 = vadd.f32 %v1298_v9, %v1621_v49  ;;  %v634_v11 = vpop.f32.mrb[19].mxu1  ;;  %v760_v13 = vmax.f32 %v640_v6, 0.0 }
 0x1ca   : > { %v635_v12 = vadd.f32 %v1621_v49, %v634_v11  ;;  %v758_v15 = vmax.f32 %v632_v8, 0.0 }
 0x1cb   : > { %v761_v14 = vmax.f32 %v643_v10, 0.0 }
 0x1cc   : > { %v759_v16 = vmax.f32 %v635_v12, 0.0 }
 0x1cd   : > { %v808_v18 = vpack.c.bf16 %v761_v14, %v760_v13 }
 0x1ce   : > { %v807_v19 = vpack.c.bf16 %v759_v16, %v758_v15  ;;  %v1301_v20 = vpop.f32.mrb[20].mxu1 }
 0x1cf   : > { %v656_v21 = vadd.f32 %v1301_v20, %v1621_v49  ;;  %v647_v22 = vpop.f32.mrb[21].mxu1 }
 0x1d0   : > { %v648_v23 = vadd.f32 %v1621_v49, %v647_v22  ;;  %v1302_v24 = vpop.f32.mrb[22].mxu1  ;;  %1343 = vmatprep.mubr.bf16.mxu0 %v807_v19 }
 0x1d1   : > { %v659_v25 = vadd.f32 %v1302_v24, %v1621_v49  ;;  %v650_v26 = vpop.f32.mrb[23].mxu1  ;;  %1344 = vmatmul.mubr.bf16.vlgmr.msra.gmra.mrb[16].mxu0 %v808_v18  ;;  %v764_v28 = vmax.f32 %v656_v21, 0.0 }
 0x1d2   : > { %v651_v27 = vadd.f32 %v1621_v49, %v650_v26  ;;  %v762_v30 = vmax.f32 %v648_v23, 0.0 }
 0x1d3   : > { %v765_v29 = vmax.f32 %v659_v25, 0.0 }
 0x1d4   : > { %v763_v31 = vmax.f32 %v651_v27, 0.0 }
 0x1d5   : > { %v810_v32 = vpack.c.bf16 %v765_v29, %v764_v28 }
 0x1d6   : > { %v809_v33 = vpack.c.bf16 %v763_v31, %v762_v30  ;;  %v1305_v34 = vpop.f32.mrb[24].mxu1 }
 0x1d7   : > { %v672_v35 = vadd.f32 %v1305_v34, %v1621_v49  ;;  %v663_v36 = vpop.f32.mrb[25].mxu1 }
 0x1d8   : > { %v664_v37 = vadd.f32 %v1621_v49, %v663_v36  ;;  %v1306_v38 = vpop.f32.mrb[26].mxu1  ;;  %1347 = vmatprep.mubr.bf16.mxu0 %v809_v33 }
 0x1d9   : > { %v675_v39 = vadd.f32 %v1306_v38, %v1621_v49  ;;  %v666_v40 = vpop.f32.mrb[27].mxu1  ;;  %1348 = vmatmul.mubr.bf16.gmra.mrb[20].mxu0 %v810_v32  ;;  %v768_v42 = vmax.f32 %v672_v35, 0.0 }
 0x1da   : > { %v667_v41 = vadd.f32 %v1621_v49, %v666_v40  ;;  %v766_v44 = vmax.f32 %v664_v37, 0.0 }
 0x1db   : > { %v769_v43 = vmax.f32 %v675_v39, 0.0 }
 0x1dc   : > { %v767_v45 = vmax.f32 %v667_v41, 0.0 }
 0x1dd   : > { %v812_v46 = vpack.c.bf16 %v769_v43, %v768_v42 }
 0x1de   : > { %v811_v47 = vpack.c.bf16 %v767_v45, %v766_v44  ;;  %v1309_v48 = vpop.f32.mrb[28].mxu1 }
 0x1df   : > { %v688_v50 = vadd.f32 %v1309_v48, %v1621_v49  ;;  %v679_v51 = vpop.f32.mrb[29].mxu1 }
 0x1e0   : > { %v680_v53 = vadd.f32 %v1621_v49, %v679_v51  ;;  %v1310_v54 = vpop.f32.mrb[30].mxu1  ;;  %1351 = vmatprep.mubr.bf16.mxu0 %v811_v47 }
 0x1e1   : > { %v691_v55 = vadd.f32 %v1310_v54, %v1621_v49  ;;  %v682_v56 = vpop.f32.mrb[31].mxu1  ;;  %1352 = vmatmul.mubr.bf16.gmra.mrb[24].mxu0 %v812_v46  ;;  %v772_v58 = vmax.f32 %v688_v50, 0.0 }
 0x1e2   : > { %v683_v57 = vadd.f32 %v1621_v49, %v682_v56  ;;  %v770_v60 = vmax.f32 %v680_v53, 0.0 }
 0x1e3   : > { %v773_v59 = vmax.f32 %v691_v55, 0.0 }
 0x1e4   : > { %v771_v61 = vmax.f32 %v683_v57, 0.0  ;;  %v1658_v57 = vld [vmem:[%s1768_s2 + $0x2] ss:$0 sm:$0xff] }
 0x1e5   : > { %v814_v62 = vpack.c.bf16 %v773_v59, %v772_v58 }
 0x1e6   : > { %v813_v63 = vpack.c.bf16 %v771_v61, %v770_v60  ;;  %v1313_v0 = vpop.f32.mrb[32].mxu1 }
 0x1e7   : > { %v704_v1 = vadd.f32 %v1313_v0, %v1621_v49  ;;  %v695_v2 = vpop.f32.mrb[33].mxu1 }
 0x1e8   : > { %v696_v3 = vadd.f32 %v1621_v49, %v695_v2  ;;  %v1314_v4 = vpop.f32.mrb[34].mxu1  ;;  %1355 = vmatprep.mubr.bf16.mxu0 %v813_v63 }
 0x1e9   : > { %v707_v17 = vadd.f32 %v1314_v4, %v1621_v49  ;;  %v698_v5 = vpop.f32.mrb[35].mxu1  ;;  %1356 = vmatmul.mubr.bf16.gmra.mrb[28].mxu0 %v814_v62  ;;  %v776_v6 = vmax.f32 %v704_v1, 0.0 }
 0x1ea   : > { %v699_v52 = vadd.f32 %v1621_v49, %v698_v5  ;;  %v774_v8 = vmax.f32 %v696_v3, 0.0 }
 0x1eb   : > { %v777_v7 = vmax.f32 %v707_v17, 0.0 }
 0x1ec   : > { %v775_v9 = vmax.f32 %v699_v52, 0.0 }
 0x1ed   : > { %v816_v10 = vpack.c.bf16 %v777_v7, %v776_v6 }
 0x1ee   : > { %v815_v11 = vpack.c.bf16 %v775_v9, %v774_v8  ;;  %v1317_v12 = vpop.f32.mrb[36].mxu1 }
 0x1ef   : > { %v720_v13 = vadd.f32 %v1317_v12, %v1621_v49  ;;  %v711_v14 = vpop.f32.mrb[37].mxu1 }
 0x1f0   : > { %v712_v15 = vadd.f32 %v1621_v49, %v711_v14  ;;  %v1318_v16 = vpop.f32.mrb[38].mxu1  ;;  %1359 = vmatprep.mubr.bf16.mxu0 %v815_v11 }
 0x1f1   : > { %v723_v18 = vadd.f32 %v1318_v16, %v1621_v49  ;;  %v714_v19 = vpop.f32.mrb[39].mxu1  ;;  %1360 = vmatmul.mubr.bf16.gmra.mrb[32].mxu0 %v816_v10  ;;  %v780_v21 = vmax.f32 %v720_v13, 0.0 }
 0x1f2   : > { %v715_v20 = vadd.f32 %v1621_v49, %v714_v19  ;;  %v778_v23 = vmax.f32 %v712_v15, 0.0 }
 0x1f3   : > { %v781_v22 = vmax.f32 %v723_v18, 0.0 }
 0x1f4   : > { %v779_v24 = vmax.f32 %v715_v20, 0.0 }
 0x1f5   : > { %v818_v25 = vpack.c.bf16 %v781_v22, %v780_v21 }
 0x1f6   : > { %v817_v26 = vpack.c.bf16 %v779_v24, %v778_v23  ;;  %v1321_v27 = vpop.f32.mrb[40].mxu1 }
 0x1f7   : > { %v736_v28 = vadd.f32 %v1321_v27, %v1621_v49  ;;  %v727_v29 = vpop.f32.mrb[41].mxu1 }
 0x1f8   : > { %v728_v30 = vadd.f32 %v1621_v49, %v727_v29  ;;  %v1322_v31 = vpop.f32.mrb[42].mxu1  ;;  %1363 = vmatprep.mubr.bf16.mxu0 %v817_v26 }
 0x1f9   : > { %v739_v32 = vadd.f32 %v1322_v31, %v1621_v49  ;;  %v730_v33 = vpop.f32.mrb[43].mxu1  ;;  %1364 = vmatmul.mubr.bf16.gmra.mrb[36].mxu0 %v818_v25  ;;  %v784_v35 = vmax.f32 %v736_v28, 0.0 }
 0x1fa   : > { %v731_v34 = vadd.f32 %v1621_v49, %v730_v33  ;;  %v782_v37 = vmax.f32 %v728_v30, 0.0 }
 0x1fb   : > { %v785_v36 = vmax.f32 %v739_v32, 0.0 }
 0x1fc   : > { %v783_v38 = vmax.f32 %v731_v34, 0.0 }
 0x1fd   : > { %v820_v39 = vpack.c.bf16 %v785_v36, %v784_v35 }
 0x1fe   : > { %v819_v40 = vpack.c.bf16 %v783_v38, %v782_v37  ;;  %v1325_v41 = vpop.f32.mrb[44].mxu1 }
 0x1ff   : > { %v752_v42 = vadd.f32 %v1325_v41, %v1621_v49  ;;  %v743_v43 = vpop.f32.mrb[45].mxu1 }
 0x200   : > { %v744_v44 = vadd.f32 %v1621_v49, %v743_v43  ;;  %v1326_v45 = vpop.f32.mrb[46].mxu1  ;;  %1367 = vmatprep.mubr.bf16.mxu0 %v819_v40 }
 0x201   : > { %v755_v46 = vadd.f32 %v1326_v45, %v1621_v49  ;;  %v746_v47 = vpop.f32.mrb[47].mxu1  ;;  %1368 = vmatmul.mubr.bf16.gmra.mrb[40].mxu0 %v820_v39  ;;  %v788_v50 = vmax.f32 %v752_v42, 0.0 }
 0x202   : > { %v747_v48 = vadd.f32 %v1621_v49, %v746_v47  ;;  %v786_v53 = vmax.f32 %v744_v44, 0.0 }
 0x203   : > { %v789_v51 = vmax.f32 %v755_v46, 0.0 }
 0x204   : > { %v787_v54 = vmax.f32 %v747_v48, 0.0 }
 0x205   : > { %v822_v55 = vpack.c.bf16 %v789_v51, %v788_v50 }
 0x206   : > { %v821_v56 = vpack.c.bf16 %v787_v54, %v786_v53 }
 0x208   : > { %1371 = vmatprep.mubr.bf16.mxu0 %v821_v56 }
 0x209   : > { %1372 = vmatmul.mubr.bf16.gmra.mrb[44].mxu0 %v822_v55 }
 0x2a4   : > { %v1345_v49 = vpop.f32.mrb[16].mxu0 }
 0x2a5   : > { %v918_v58 = vadd.f32 %v1345_v49, %v1658_v57  ;;  %v909_v59 = vpop.f32.mrb[17].mxu0 }
 0x2a6   : > { %v910_v60 = vadd.f32 %v1658_v57, %v909_v59  ;;  %v1346_v61 = vpop.f32.mrb[18].mxu0 }
 0x2a7   : > { %1039 = vst.msk [vmem:[%s1665_s15 + $0x10] sm:$0xff] %vm1036_vm2, %v918_v58  ;;  %v921_v62 = vadd.f32 %v1346_v61, %v1658_v57  ;;  %v912_v63 = vpop.f32.mrb[19].mxu0 }
 0x2a8   : > { %1037 = vst.msk [vmem:[%s1665_s15] sm:$0xff] %vm1036_vm2, %v910_v60  ;;  %v913_v0 = vadd.f32 %v1658_v57, %v912_v63 }
 0x2a9   : > { %1040 = vst.msk [vmem:[%s1665_s15 + $0x18] sm:$0xff] %vm1036_vm2, %v921_v62 }
 0x2aa   : > { %1038 = vst.msk [vmem:[%s1665_s15 + $0x8] sm:$0xff] %vm1036_vm2, %v913_v0 }
 0x2ac   : > { %v1349_v1 = vpop.f32.mrb[20].mxu0 }
 0x2ad   : > { %v934_v2 = vadd.f32 %v1349_v1, %v1658_v57  ;;  %v925_v3 = vpop.f32.mrb[21].mxu0 }
 0x2ae   : > { %v926_v4 = vadd.f32 %v1658_v57, %v925_v3  ;;  %v1350_v17 = vpop.f32.mrb[22].mxu0 }
 0x2af   : > { %1043 = vst.msk [vmem:[%s1665_s15 + $0x30] sm:$0xff] %vm1036_vm2, %v934_v2  ;;  %v937_v5 = vadd.f32 %v1350_v17, %v1658_v57  ;;  %v928_v52 = vpop.f32.mrb[23].mxu0 }
 0x2b0   : > { %1041 = vst.msk [vmem:[%s1665_s15 + $0x20] sm:$0xff] %vm1036_vm2, %v926_v4  ;;  %v929_v6 = vadd.f32 %v1658_v57, %v928_v52 }
 0x2b1   : > { %1044 = vst.msk [vmem:[%s1665_s15 + $0x38] sm:$0xff] %vm1036_vm2, %v937_v5 }
 0x2b2   : > { %1042 = vst.msk [vmem:[%s1665_s15 + $0x28] sm:$0xff] %vm1036_vm2, %v929_v6 }
 0x2b4   : > { %v1353_v7 = vpop.f32.mrb[24].mxu0 }
 0x2b5   : > { %v950_v8 = vadd.f32 %v1353_v7, %v1658_v57  ;;  %v941_v9 = vpop.f32.mrb[25].mxu0 }
 0x2b6   : > { %v942_v10 = vadd.f32 %v1658_v57, %v941_v9  ;;  %v1354_v11 = vpop.f32.mrb[26].mxu0 }
 0x2b7   : > { %1047 = vst.msk [vmem:[%s1665_s15 + $0x50] sm:$0xff] %vm1036_vm2, %v950_v8  ;;  %v953_v12 = vadd.f32 %v1354_v11, %v1658_v57  ;;  %v944_v13 = vpop.f32.mrb[27].mxu0 }
 0x2b8   : > { %1045 = vst.msk [vmem:[%s1665_s15 + $0x40] sm:$0xff] %vm1036_vm2, %v942_v10  ;;  %v945_v14 = vadd.f32 %v1658_v57, %v944_v13 }
 0x2b9   : > { %1048 = vst.msk [vmem:[%s1665_s15 + $0x58] sm:$0xff] %vm1036_vm2, %v953_v12 }
 0x2ba   : > { %1046 = vst.msk [vmem:[%s1665_s15 + $0x48] sm:$0xff] %vm1036_vm2, %v945_v14 }
 0x2bc   : > { %v1357_v15 = vpop.f32.mrb[28].mxu0 }
 0x2bd   : > { %v966_v16 = vadd.f32 %v1357_v15, %v1658_v57  ;;  %v957_v18 = vpop.f32.mrb[29].mxu0 }
 0x2be   : > { %v958_v19 = vadd.f32 %v1658_v57, %v957_v18  ;;  %v1358_v20 = vpop.f32.mrb[30].mxu0 }
 0x2bf   : > { %1051 = vst.msk [vmem:[%s1665_s15 + $0x70] sm:$0xff] %vm1036_vm2, %v966_v16  ;;  %v969_v21 = vadd.f32 %v1358_v20, %v1658_v57  ;;  %v960_v22 = vpop.f32.mrb[31].mxu0 }
 0x2c0   : > { %1049 = vst.msk [vmem:[%s1665_s15 + $0x60] sm:$0xff] %vm1036_vm2, %v958_v19  ;;  %v961_v23 = vadd.f32 %v1658_v57, %v960_v22 }
 0x2c1   : > { %1052 = vst.msk [vmem:[%s1665_s15 + $0x78] sm:$0xff] %vm1036_vm2, %v969_v21 }
 0x2c2   : > { %1050 = vst.msk [vmem:[%s1665_s15 + $0x68] sm:$0xff] %vm1036_vm2, %v961_v23 }
 0x2c4   : > { %v1361_v24 = vpop.f32.mrb[32].mxu0 }
 0x2c5   : > { %v982_v25 = vadd.f32 %v1361_v24, %v1658_v57  ;;  %v973_v26 = vpop.f32.mrb[33].mxu0 }
 0x2c6   : > { %v974_v27 = vadd.f32 %v1658_v57, %v973_v26  ;;  %v1362_v28 = vpop.f32.mrb[34].mxu0 }
 0x2c7   : > { %1055 = vst.msk [vmem:[%s1665_s15 + $0x90] sm:$0xff] %vm1036_vm2, %v982_v25  ;;  %v985_v29 = vadd.f32 %v1362_v28, %v1658_v57  ;;  %v976_v30 = vpop.f32.mrb[35].mxu0 }
 0x2c8   : > { %1053 = vst.msk [vmem:[%s1665_s15 + $0x80] sm:$0xff] %vm1036_vm2, %v974_v27  ;;  %v977_v31 = vadd.f32 %v1658_v57, %v976_v30 }
 0x2c9   : > { %1056 = vst.msk [vmem:[%s1665_s15 + $0x98] sm:$0xff] %vm1036_vm2, %v985_v29 }
 0x2ca   : > { %1054 = vst.msk [vmem:[%s1665_s15 + $0x88] sm:$0xff] %vm1036_vm2, %v977_v31 }
 0x2cc   : > { %v1365_v32 = vpop.f32.mrb[36].mxu0 }
 0x2cd   : > { %v998_v33 = vadd.f32 %v1365_v32, %v1658_v57  ;;  %v989_v34 = vpop.f32.mrb[37].mxu0 }
 0x2ce   : > { %v990_v35 = vadd.f32 %v1658_v57, %v989_v34  ;;  %v1366_v36 = vpop.f32.mrb[38].mxu0 }
 0x2cf   : > { %1059 = vst.msk [vmem:[%s1665_s15 + $0xb0] sm:$0xff] %vm1036_vm2, %v998_v33  ;;  %v1001_v37 = vadd.f32 %v1366_v36, %v1658_v57  ;;  %v992_v38 = vpop.f32.mrb[39].mxu0 }
 0x2d0   : > { %1057 = vst.msk [vmem:[%s1665_s15 + $0xa0] sm:$0xff] %vm1036_vm2, %v990_v35  ;;  %v993_v39 = vadd.f32 %v1658_v57, %v992_v38 }
 0x2d1   : > { %1060 = vst.msk [vmem:[%s1665_s15 + $0xb8] sm:$0xff] %vm1036_vm2, %v1001_v37 }
 0x2d2   : > { %1058 = vst.msk [vmem:[%s1665_s15 + $0xa8] sm:$0xff] %vm1036_vm2, %v993_v39 }
 0x2d4   : > { %v1369_v40 = vpop.f32.mrb[40].mxu0 }
 0x2d5   : > { %v1014_v41 = vadd.f32 %v1369_v40, %v1658_v57  ;;  %v1005_v42 = vpop.f32.mrb[41].mxu0 }
 0x2d6   : > { %v1006_v43 = vadd.f32 %v1658_v57, %v1005_v42  ;;  %v1370_v44 = vpop.f32.mrb[42].mxu0 }
 0x2d7   : > { %1063 = vst.msk [vmem:[%s1665_s15 + $0xd0] sm:$0xff] %vm1036_vm2, %v1014_v41  ;;  %v1017_v45 = vadd.f32 %v1370_v44, %v1658_v57  ;;  %v1008_v46 = vpop.f32.mrb[43].mxu0 }
 0x2d8   : > { %1061 = vst.msk [vmem:[%s1665_s15 + $0xc0] sm:$0xff] %vm1036_vm2, %v1006_v43  ;;  %v1009_v47 = vadd.f32 %v1658_v57, %v1008_v46 }
 0x2d9   : > { %1064 = vst.msk [vmem:[%s1665_s15 + $0xd8] sm:$0xff] %vm1036_vm2, %v1017_v45 }
 0x2da   : > { %1062 = vst.msk [vmem:[%s1665_s15 + $0xc8] sm:$0xff] %vm1036_vm2, %v1009_v47 }
 0x2dc   : > { %v1373_v48 = vpop.f32.mrb[44].mxu0 }
 0x2dd   : > { %v1030_v50 = vadd.f32 %v1373_v48, %v1658_v57  ;;  %v1021_v51 = vpop.f32.mrb[45].mxu0 }
 0x2de   : > { %v1022_v53 = vadd.f32 %v1658_v57, %v1021_v51  ;;  %v1374_v54 = vpop.f32.mrb[46].mxu0 }
 0x2df   : > { %1067 = vst.msk [vmem:[%s1665_s15 + $0xf0] sm:$0xff] %vm1036_vm2, %v1030_v50  ;;  %v1033_v55 = vadd.f32 %v1374_v54, %v1658_v57  ;;  %v1024_v56 = vpop.f32.mrb[47].mxu0 }
 0x2e0   : > { %1065 = vst.msk [vmem:[%s1665_s15 + $0xe0] sm:$0xff] %vm1036_vm2, %v1022_v53  ;;  %v1025_v49 = vadd.f32 %v1658_v57, %v1024_v56 }
 0x2e1   : > { %1068 = vst.msk [vmem:[%s1665_s15 + $0xf8] sm:$0xff] %vm1036_vm2, %v1033_v55 }
 0x2e2   : > { %1066 = vst.msk [vmem:[%s1665_s15 + $0xe8] sm:$0xff] %vm1036_vm2, %v1025_v49 }
 0x2e3 PF: > { %s13_s12 = sadd.s32 1, %s1414_s12  }
 0x2e4   : > { %p10_p4 = scmp.ge.s32.totalorder %s13_s12, 4  }
 0x2e6   :  { %12 = sbr.rel (!%p10_p4) target bundleno = 1 (0x1), region = 62 }

</bundles_post_ra>
